<compile_context>
chip_gen: v6e
topology: v6e:2x2x1
jax: 0.10.0
libtpu: 0.0.40
codegen_flags: <defaults>
</compile_context>

<pallas_src>
import functools

import jax
import jax.numpy as jnp
import numpy as np
from jax.experimental import pallas as pl
from jax.experimental.pallas import tpu as pltpu


def _round_up(x, m):
    return ((x + m - 1) // m) * m


def _default_config():
    """Generation-aware defaults: big tiles everywhere, 2 shards only on 2-TC chips."""
    kind = ""
    try:
        kind = jax.devices()[0].device_kind.lower()
    except Exception:
        pass
    is_two_tc = ("v7" in kind) or ("7x" in kind)     # v7x: 2 TensorCores / chip
    tile_n = 8192 if is_two_tc else 4096
    num_shards = 2 if is_two_tc else 1
    return tile_n, num_shards


def _ang_ce_kernel(label_ref, pred_ref, out_ref, acc_ref, *, tile_n, n_total):
    s = pl.program_id(0)               # shard (megacore split on v7x; size 1 elsewhere)
    j = pl.program_id(1)               # row-tile within this shard
    n_j = pl.num_programs(1)
    tile_idx = s * n_j + j             # global (unclamped) row-tile index
    row0 = tile_idx * tile_n           # first global row covered by this tile

    @pl.when(j == 0)
    def _init():
        acc_ref[...] = jnp.zeros_like(acc_ref)

    pred = pred_ref[...]                                      # (tile_n, C), native dtype
    lbl = label_ref[...]                                      # (tile_n, 1) int32

    # Gather the labeled probability per row: one (1, C) iota vreg broadcast against
    # the (tile_n, 1) labels, lane-reduce of the select (only one nonzero per row),
    # then cast and take -log() only on the gathered (tile_n, 1) column.
    col = jax.lax.broadcasted_iota(jnp.int32, (1, pred.shape[-1]), 1)
    sel = jnp.where(col == lbl, pred, jnp.zeros_like(pred))
    p = jnp.sum(sel, axis=-1, keepdims=True).astype(jnp.float32)
    row_loss = -jnp.log(p + jnp.float32(1e-8))                # (tile_n, 1) f32

    # Fast path: tile entirely in range — reduce straight to (1, 1), no masking.
    @pl.when(row0 + tile_n <= n_total)
    def _full_tile():
        acc_ref[...] += jnp.sum(row_loss, keepdims=True)

    # Ragged (or clamped out-of-range) tile: SELECT padded rows to zero before the
    # reduce so garbage VMEM (even NaN/Inf) never reaches the accumulator.
    @pl.when(row0 + tile_n > n_total)
    def _ragged_tile():
        row = jax.lax.broadcasted_iota(jnp.int32, (tile_n, 1), 0) + row0
        masked = jnp.where(row < n_total, row_loss, 0.0)
        acc_ref[...] += jnp.sum(masked, keepdims=True)

    # Emit this shard's partial sum as a lane-dense (8, 128) block on the last tile.
    @pl.when(j == n_j - 1)
    def _finish():
        out_ref[...] = jnp.zeros_like(out_ref) + jnp.sum(acc_ref[...])


def ang_cross_entropy(pred, label, *, num_class=121, tile_n=None, num_shards=None):
    """pred: (N, num_class) float probabilities (f32 or bf16); label: (N,) int labels."""
    n, c = pred.shape
    assert c == num_class
    label2d = label.astype(jnp.int32).reshape(n, 1)

    auto_tile, auto_shards = _default_config()
    if tile_n is None:
        tile_n = auto_tile
    if num_shards is None:
        num_shards = auto_shards

    # Large row tiles (multiple of 8), clamped so one tile never vastly exceeds N.
    tile_n = max(8, min(_round_up(tile_n, 8), _round_up(n, 8)))
    n_tiles = pl.cdiv(n, tile_n)
    # Never allocate a shard that would be 100% clamped/redundant work.
    num_shards = max(1, min(num_shards, n_tiles))
    tiles_per_shard = pl.cdiv(n_tiles, num_shards)

    def row_map(s, j):
        # Clamp: tiles past the end re-read the last real tile; their rows are
        # fully masked inside the kernel, so they contribute exactly 0.
        return (jnp.minimum(s * tiles_per_shard + j, n_tiles - 1), 0)

    kernel = functools.partial(_ang_ce_kernel, tile_n=tile_n, n_total=n)
    partials = pl.pallas_call(
        kernel,
        out_shape=jax.ShapeDtypeStruct((num_shards * 8, 128), jnp.float32),
        grid_spec=pltpu.PrefetchScalarGridSpec(
            num_scalar_prefetch=0,
            grid=(num_shards, tiles_per_shard),
            in_specs=[
                pl.BlockSpec((tile_n, 1), row_map),      # labels
                pl.BlockSpec((tile_n, c), row_map),      # pred (dominant HBM stream)
            ],
            out_specs=pl.BlockSpec((8, 128), lambda s, j: (s, 0)),
            scratch_shapes=[pltpu.VMEM((1, 1), jnp.float32)],   # one-vreg accumulator
        ),
        compiler_params=pltpu.CompilerParams(
            dimension_semantics=("parallel", "arbitrary")),
    )(label2d, pred)

    # Combine per-shard partial sums; mean over ALL N*C elements (matches .mean()).
    return jnp.sum(partials[0::8, 0]) / jnp.float32(n * num_class)


if __name__ == "__main__":
    NUM_CLASS = 121
    N = 300

    key = jax.random.PRNGKey(0)
    k_logits, k_label = jax.random.split(key)
    # Probability-like predictions (what the PyTorch module expects, given log(pred)).
    pred = jax.nn.softmax(
        jax.random.normal(k_logits, (N, NUM_CLASS), dtype=jnp.float32), axis=-1)
    label = jax.random.randint(k_label, (N,), 0, NUM_CLASS, dtype=jnp.int32)

    # Pure-JAX reference of the PyTorch forward.
    one_hot = jax.nn.one_hot(label, NUM_CLASS, dtype=jnp.float32)
    ref = jnp.mean(-one_hot * jnp.log(pred + 1e-8))

    # Small tile + forced 2 shards: exercises full tiles, the ragged last tile, and
    # the clamped out-of-range tile of the second shard.
    loss_small = jax.block_until_ready(
        ang_cross_entropy(pred, label, num_class=NUM_CLASS, tile_n=64, num_shards=2))
    assert np.allclose(np.asarray(loss_small), np.asarray(ref),
                       rtol=2e-5, atol=1e-6), (loss_small, ref)

    # Default (generation-aware) production path.
    loss_default = jax.block_until_ready(
        ang_cross_entropy(pred, label, num_class=NUM_CLASS))
    assert np.allclose(np.asarray(loss_default), np.asarray(ref),
                       rtol=2e-5, atol=1e-6), (loss_default, ref)

    print("KERNEL_OK")
</pallas_src>

<mosaic_0001>
module attributes {stable_mosaic.version = 11 : i64} {
  func.func @_ang_ce_kernel(%arg0: i32, %arg1: i32, %arg2: memref<64x1xi32, #tpu.memory_space<vmem>>, %arg3: memref<64x121xf32, #tpu.memory_space<vmem>>, %arg4: memref<8x128xf32, #tpu.memory_space<vmem>>, %arg5: memref<1x1xf32, #tpu.memory_space<vmem>>) attributes {dimension_semantics = [#tpu.dimension_semantics<parallel>, #tpu.dimension_semantics<arbitrary>], iteration_bounds = array<i64: 2, 3>, scalar_prefetch = 0 : i64, scratch_operands = 1 : i64, tpu.core_type = #tpu.core_type<tc>, window_params = [{transform_indices = @transform_0, window_bounds = array<i64: 64, 1>}, {transform_indices = @transform_1, window_bounds = array<i64: 64, 121>}, {transform_indices = @transform_2, window_bounds = array<i64: 8, 128>}]} {
    %c3_i32 = arith.constant 3 : i32
    %0 = arith.muli %arg0, %c3_i32 : i32
    %1 = arith.addi %0, %arg1 : i32
    %c64_i32 = arith.constant 64 : i32
    %2 = arith.muli %1, %c64_i32 : i32
    %c0_i32 = arith.constant 0 : i32
    %3 = arith.cmpi eq, %arg1, %c0_i32 : i32
    %4 = arith.extui %3 : i1 to i32
    %c0_i32_0 = arith.constant 0 : i32
    %5 = arith.cmpi ne, %4, %c0_i32_0 : i32
    scf.if %5 {
      %cst_13 = arith.constant 0.000000e+00 : f32
      %32 = vector.broadcast %cst_13 : f32 to vector<1x1xf32>
      %c0_14 = arith.constant 0 : index
      %c0_15 = arith.constant 0 : index
      %33 = vector.load %arg5[%c0_14, %c0_15] : memref<1x1xf32, #tpu.memory_space<vmem>>, vector<1x1xf32>
      tpu.vector_store %arg5[%c0_14, %c0_15], %32 {strides = array<i32>} : memref<1x1xf32, #tpu.memory_space<vmem>>, vector<1x1xf32>,
    } else {
    }
    %c0 = arith.constant 0 : index
    %c0_1 = arith.constant 0 : index
    %6 = vector.load %arg3[%c0, %c0_1] : memref<64x121xf32, #tpu.memory_space<vmem>>, vector<64x121xf32>
    %c0_2 = arith.constant 0 : index
    %c0_3 = arith.constant 0 : index
    %7 = vector.load %arg2[%c0_2, %c0_3] : memref<64x1xi32, #tpu.memory_space<vmem>>, vector<64x1xi32>
    %8 = tpu.iota {dimensions = array<i32: 1>} : vector<1x121xi32>
    %9 = vector.broadcast %8 : vector<1x121xi32> to vector<64x121xi32>
    %10 = vector.broadcast %7 : vector<64x1xi32> to vector<64x121xi32>
    %11 = arith.cmpi eq, %9, %10 : vector<64x121xi32>
    %cst = arith.constant 0.000000e+00 : f32
    %12 = vector.broadcast %cst : f32 to vector<64x121xf32>
    %13 = arith.select %11, %6, %12 : vector<64x121xi1>, vector<64x121xf32>
    %cst_4 = arith.constant dense<0.000000e+00> : vector<64xf32>
    %14 = vector.multi_reduction <add>, %13, %cst_4 [1] : vector<64x121xf32> to vector<64xf32>
    %15 = vector.shape_cast %14 : vector<64xf32> to vector<64x1xf32>
    %cst_5 = arith.constant 9.99999993E-9 : f32
    %16 = vector.broadcast %cst_5 : f32 to vector<64x1xf32>
    %17 = arith.addf %15, %16 : vector<64x1xf32>
    %18 = math.log %17 : vector<64x1xf32>
    %cst_6 = arith.constant 0.000000e+00 : f32
    %19 = vector.broadcast %cst_6 : f32 to vector<64x1xf32>
    %20 = arith.subf %19, %18 : vector<64x1xf32>
    %c64_i32_7 = arith.constant 64 : i32
    %21 = arith.addi %2, %c64_i32_7 : i32
    %c300_i32 = arith.constant 300 : i32
    %22 = arith.cmpi sle, %21, %c300_i32 : i32
    %23 = arith.extui %22 : i1 to i32
    %c0_i32_8 = arith.constant 0 : i32
    %24 = arith.cmpi ne, %23, %c0_i32_8 : i32
    scf.if %24 {
      %c0_13 = arith.constant 0 : index
      %c0_14 = arith.constant 0 : index
      %32 = vector.load %arg5[%c0_13, %c0_14] : memref<1x1xf32, #tpu.memory_space<vmem>>, vector<1x1xf32>
      %33 = vector.shape_cast %20 : vector<64x1xf32> to vector<1x64x1xf32>
      %cst_15 = arith.constant dense<0.000000e+00> : vector<1xf32>
      %34 = vector.multi_reduction <add>, %33, %cst_15 [1, 2] : vector<1x64x1xf32> to vector<1xf32>
      %35 = vector.shape_cast %34 : vector<1xf32> to vector<1x1x1xf32>
      %36 = vector.extract %35[0, 0, 0] : f32 from vector<1x1x1xf32>
      %37 = vector.broadcast %36 : f32 to vector<1x1xf32>
      %38 = arith.addf %32, %37 : vector<1x1xf32>
      %c0_16 = arith.constant 0 : index
      %c0_17 = arith.constant 0 : index
      %39 = vector.load %arg5[%c0_16, %c0_17] : memref<1x1xf32, #tpu.memory_space<vmem>>, vector<1x1xf32>
      tpu.vector_store %arg5[%c0_16, %c0_17], %38 {strides = array<i32>} : memref<1x1xf32, #tpu.memory_space<vmem>>, vector<1x1xf32>,
    } else {
    }
    %c64_i32_9 = arith.constant 64 : i32
    %25 = arith.addi %2, %c64_i32_9 : i32
    %c300_i32_10 = arith.constant 300 : i32
    %26 = arith.cmpi sgt, %25, %c300_i32_10 : i32
    %27 = arith.extui %26 : i1 to i32
    %c0_i32_11 = arith.constant 0 : i32
    %28 = arith.cmpi ne, %27, %c0_i32_11 : i32
    scf.if %28 {
      %32 = tpu.iota {dimensions = array<i32: 0>} : vector<64x1xi32>
      %33 = vector.broadcast %2 : i32 to vector<64x1xi32>
      %34 = arith.addi %32, %33 : vector<64x1xi32>
      %c300_i32_13 = arith.constant 300 : i32
      %35 = vector.broadcast %c300_i32_13 : i32 to vector<64x1xi32>
      %36 = arith.cmpi slt, %34, %35 : vector<64x1xi32>
      %cst_14 = arith.constant 0.000000e+00 : f32
      %37 = vector.broadcast %cst_14 : f32 to vector<64x1xf32>
      %38 = arith.select %36, %20, %37 : vector<64x1xi1>, vector<64x1xf32>
      %c0_15 = arith.constant 0 : index
      %c0_16 = arith.constant 0 : index
      %39 = vector.load %arg5[%c0_15, %c0_16] : memref<1x1xf32, #tpu.memory_space<vmem>>, vector<1x1xf32>
      %40 = vector.shape_cast %38 : vector<64x1xf32> to vector<1x64x1xf32>
      %cst_17 = arith.constant dense<0.000000e+00> : vector<1xf32>
      %41 = vector.multi_reduction <add>, %40, %cst_17 [1, 2] : vector<1x64x1xf32> to vector<1xf32>
      %42 = vector.shape_cast %41 : vector<1xf32> to vector<1x1x1xf32>
      %43 = vector.extract %42[0, 0, 0] : f32 from vector<1x1x1xf32>
      %44 = vector.broadcast %43 : f32 to vector<1x1xf32>
      %45 = arith.addf %39, %44 : vector<1x1xf32>
      %c0_18 = arith.constant 0 : index
      %c0_19 = arith.constant 0 : index
      %46 = vector.load %arg5[%c0_18, %c0_19] : memref<1x1xf32, #tpu.memory_space<vmem>>, vector<1x1xf32>
      tpu.vector_store %arg5[%c0_18, %c0_19], %45 {strides = array<i32>} : memref<1x1xf32, #tpu.memory_space<vmem>>, vector<1x1xf32>,
    } else {
    }
    %c2_i32 = arith.constant 2 : i32
    %29 = arith.cmpi eq, %arg1, %c2_i32 : i32
    %30 = arith.extui %29 : i1 to i32
    %c0_i32_12 = arith.constant 0 : i32
    %31 = arith.cmpi ne, %30, %c0_i32_12 : i32
    scf.if %31 {
      %cst_13 = arith.constant 0.000000e+00 : f32
      %32 = vector.broadcast %cst_13 : f32 to vector<8x128xf32>
      %c0_14 = arith.constant 0 : index
      %c0_15 = arith.constant 0 : index
      %33 = vector.load %arg5[%c0_14, %c0_15] : memref<1x1xf32, #tpu.memory_space<vmem>>, vector<1x1xf32>
      %34 = vector.shape_cast %33 : vector<1x1xf32> to vector<1x1x1xf32>
      %cst_16 = arith.constant dense<0.000000e+00> : vector<1xf32>
      %35 = vector.multi_reduction <add>, %34, %cst_16 [1, 2] : vector<1x1x1xf32> to vector<1xf32>
      %36 = vector.shape_cast %35 : vector<1xf32> to vector<1x1x1xf32>
      %37 = vector.extract %36[0, 0, 0] : f32 from vector<1x1x1xf32>
      %38 = vector.broadcast %37 : f32 to vector<8x128xf32>
      %39 = arith.addf %32, %38 : vector<8x128xf32>
      %c0_17 = arith.constant 0 : index
      %c0_18 = arith.constant 0 : index
      %40 = vector.load %arg4[%c0_17, %c0_18] : memref<8x128xf32, #tpu.memory_space<vmem>>, vector<8x128xf32>
      tpu.vector_store %arg4[%c0_17, %c0_18], %39 {strides = array<i32>} : memref<8x128xf32, #tpu.memory_space<vmem>>, vector<8x128xf32>,
    } else {
    }
    return
  }
  func.func @transform_0(%arg0: i32, %arg1: i32) -> (i32, i32) {
    %c3_i32 = arith.constant 3 : i32
    %0 = arith.muli %arg0, %c3_i32 : i32
    %1 = arith.addi %0, %arg1 : i32
    %c4_i32 = arith.constant 4 : i32
    %2 = arith.minsi %1, %c4_i32 : i32
    %c0_i32 = arith.constant 0 : i32
    %c0_i32_0 = arith.constant 0 : i32
    return %2, %c0_i32 : i32, i32
  }
  func.func @transform_1(%arg0: i32, %arg1: i32) -> (i32, i32) {
    %c3_i32 = arith.constant 3 : i32
    %0 = arith.muli %arg0, %c3_i32 : i32
    %1 = arith.addi %0, %arg1 : i32
    %c4_i32 = arith.constant 4 : i32
    %2 = arith.minsi %1, %c4_i32 : i32
    %c0_i32 = arith.constant 0 : i32
    %c0_i32_0 = arith.constant 0 : i32
    return %2, %c0_i32 : i32, i32
  }
  func.func @transform_2(%arg0: i32, %arg1: i32) -> (i32, i32) {
    %c0_i32 = arith.constant 0 : i32
    %c0_i32_0 = arith.constant 0 : i32
    return %arg0, %c0_i32 : i32, i32
  }
}

</mosaic_0001>

<bundles_post_ra>
// kernel: tpu_custom_call.1
= control target key start
LH: loop header
LB: loop body
LE: loop exit
PB: predicated region body
PF: predicated region fallthrough
CT: control target
= control target key end

     0   :  { %7 = vsyncpa [#allocation4], 0  ;;  %s1067_s0 = inlined_call_operand.vmem [shape: s32[300,1], index: 0, kind: input, shape index: {}]   ;;  %s1068_s1 = inlined_call_operand.vmem [shape: f32[300,121], index: 1, kind: input, shape index: {}]   ;;  %s1069_s2 = inlined_call_operand.hbm [shape: f32[16,128], index: 2, kind: output, shape index: {}]  }
   0x1   :  { %9 = vsyncpa [#allocation4 + $0x1], 0  ;;  %s835_s9 = smov 0   ;;  %s837_s10 = smov 0  }
   0x2   :  { %s839_s11 = smov 0   ;;  %s841_s12 = smov 0  }
   0x3   :  { %s843_s13 = smov 0   ;;  %s845_s14 = smov 0  }
   0x4   :  { %s847_s15 = smov 0   ;;  %s849_s16 = smov 0  }
   0x5 LB: > { %s607_s17 = sadd.s32 4294967295, %s815_s16   ;;  %s608_s18 = sadd.s32 4294967294, %s815_s16   ;;  %s815_s16 = sphi %s849_s16, %s15_s16   ;;  %s811_s15 = sphi %s847_s15, %s1078_s15   ;;  %s807_s14 = sphi %s845_s14, %s1077_s14   ;;  %s803_s13 = sphi %s843_s13, %s1076_s13   ;;  %s799_s12 = sphi %s841_s12, %s1075_s12   ;;  %s795_s11 = sphi %s839_s11, %s1074_s11   ;;  %s791_s10 = sphi %s837_s10, %s1073_s10   ;;  %s787_s9 = sphi %s835_s9, %s1072_s9  }
   0x6   : > { %s24_s19 = sadd.s32 1, %s807_s14  ;;  %s27_s20 = sadd.s32 1, %s811_s15 }
   0x7   : > { %p25_p0 = scmp.ge.s32.totalorder %s24_s19, 3  ;;  %p112_p1 = scmp.ne.s32.totalorder %s795_s11, %s791_s10 }
   0x8   : > { %p113_p2 = scmp.eq.s32.totalorder %s607_s17, 5  ;;  %p118_p4 = scmp.ne.s32.totalorder %s791_s10, %s787_s9 }
   0x9   : > { %s1080_s19 = smov (%p25_p0, %s24_s19), 0  ;;  %s1082_s20 = smov (!%p25_p0, %s27_s20), %s811_s15 }
   0xa   : > { %p884_p3 = por %p113_p2, %p112_p1  ;;  %p29_p5 = scmp.ge.s32.totalorder %s1082_s20, 2 }
   0xb   : > { %p119_p6 = scmp.eq.s32.totalorder %s608_s18, 5  ;;  %p611_p7 = scmp.ge.s32.totalorder %s815_s16, 1 }
   0xc   : > { %p187_p8 = scmp.lt.s32.totalorder %s815_s16, 7  ;;  %s1084_s20 = smov (%p29_p5, %s1082_s20), 0 }
   0xd   : > { %p894_p9 = por %p119_p6, %p118_p4  ;;  %s99_s23 = ssub.s32 %s811_s15, %s1084_s20 }
   0xe   : > { %p188_p10 = pnand %p611_p7, %p187_p8  ;;  %s102_s24 = sadd.s32 1, %s795_s11 }
   0xf   : > { %p100_p11 = scmp.eq.s32.totalorder %s99_s23, 0  ;;  %s227_s26 = sand.u32 (!%p188_p10), 1, %s791_s10  }
  0x10   : > { %191 = sbr.rel (%p188_p10) target bundleno = 872 (0x368), region = 28  ;;  %s908_s28 = sshll.u32 (!%p188_p10), %s227_s26, 3 }
  0x11   : > { %s902_s25 = scalar_select %p100_p11, %s795_s11, %s102_s24  }
  0x12   : > { %s230_s27 = smul.u32 (!%p188_p10), 3, %s803_s13  ;;  %s229_s24 = scalar_lea.vmem (!%p188_p10), [#allocation3], %s908_s28 }
  0x13   : > { %p618_p0 = scmp.ne.s32.totalorder (!%p188_p10), %s799_s12, 0 }
  0x14   : > { %s911_s29 = sadd.s32 (!%p188_p10), %s799_s12, %s230_s27 }
  0x15   : > { %p232_p12 = scmp.lt.s32.totalorder %s911_s29, 4  ;;  %s617_s30 = sshll.u32 %s911_s29, 6 }
  0x17   : > { %s233_s3 = scalar_select %p232_p12, %s911_s29, 4 }
  0x19   : > { %s613_s4 = sshll.u32 %s233_s3, 3 }
  0x1a   : > { %p239_p13 = scmp.lt.s32.totalorder %s613_s4, 37  ;;  %280 = sbr.rel (%p618_p0) target bundleno = 33 (0x21), region = 32 }
  0x1c   : > { %s1086_s4 = smov (!%p239_p13, %s613_s4), 37 }
  0x1d   : > { %s614_s5 = sshll.u32 %s1086_s4, 3 }
  0x1e   : > { %s242_s8 = scalar_lea.vmem %s1067_s0, %s614_s5  ;;  %s922_s23 = scalar_lea.vmem %s1068_s1, %s614_s5 }
  0x1f   : > { %vm281_vm0 = vcmask 0   ;;  %v817_v0 = vmov 0.0  }
  0x20   : > { %282 = vst.msk [vmem:[#allocation2] sm:$0x1] %vm281_vm0, %v817_v0 }
  0x21 PF: > { %v293_v1 = vld [vmem:[%s242_s8 + $0x10] sm:$0xff]  ;;  %v291_v2 = vld [vmem:[%s242_s8] sm:$0xff]  ;;  %v818_v3 = vmov 0   ;;  %v294_v4 = vld [vmem:[%s242_s8 + $0x18] sm:$0xff]  ;;  %v299_v10 = vlaneseq  ;;  %vm341_vm1 = vcmask 990208   ;;  %s945_s27 = sadd.s32 64, %s617_s30 }
  0x22   : > { %706 = vset.pattern.permute.xlu1 %v818_v3  ;;  %705 = vset.pattern.permute.xlu0 %v818_v3  ;;  %v292_v5 = vld [vmem:[%s242_s8 + $0x8] sm:$0xff]  ;;  %v295_v7 = vld [vmem:[%s242_s8 + $0x20] sm:$0xff]  ;;  %v298_v8 = vld [vmem:[%s242_s8 + $0x38] sm:$0xff]  ;;  %p619_p1 = scmp.gt.s32.totalorder %s945_s27, 300 }
  0x23   : > { %308 = vperm.xlu1 %706, %v293_v1   ;;  %302 = vperm.xlu0 %705, %v291_v2   ;;  %v296_v6 = vld [vmem:[%s242_s8 + $0x28] sm:$0xff]  ;;  %v297_v9 = vld [vmem:[%s242_s8 + $0x30] sm:$0xff]  ;;  %v300_v11 = vand.u32 127, %v299_v10  ;;  %v283_v12 = vld [vmem:[%s922_s23] sm:$0xff] }
  0x24   : > { %v285_v13 = vld [vmem:[%s922_s23 + $0x10] sm:$0xff]  ;;  %v284_v19 = vld [vmem:[%s922_s23 + $0x8] sm:$0xff]  ;;  %v286_v23 = vld [vmem:[%s922_s23 + $0x18] sm:$0xff] }
  0x25   : > { %v287_v26 = vld [vmem:[%s922_s23 + $0x20] sm:$0xff]  ;;  %v288_v30 = vld [vmem:[%s922_s23 + $0x28] sm:$0xff]  ;;  %v289_v34 = vld [vmem:[%s922_s23 + $0x30] sm:$0xff] }
  0x26   : > { %v290_v38 = vld [vmem:[%s922_s23 + $0x38] sm:$0xff] }
  0x27   : > { %311 = vperm.xlu1 %706, %v294_v4   ;;  %305 = vperm.xlu0 %705, %v292_v5  }
  0x2b   : > { %317 = vperm.xlu1 %706, %v296_v6   ;;  %314 = vperm.xlu0 %705, %v295_v7  }
  0x2f   : > { %323 = vperm.xlu1 %706, %v298_v8   ;;  %320 = vperm.xlu0 %705, %v297_v9  }
  0x9e   : > { %v309_v14 = vpop.permute.xlu1 %308  ;;  %v303_v15 = vpop.permute.xlu0 %302 }
  0x9f   : > { %vm327_vm2 = vcmp.eq.s32.totalorder %v300_v11, %v309_v14  ;;  %vm325_vm3 = vcmp.eq.s32.totalorder %v300_v11, %v303_v15 }
  0xa0   : > { %v333_v16 = vsel %vm325_vm3, %v283_v12, 0.0  ;;  %v335_v17 = vsel %vm327_vm2, %v285_v13, 0.0 }
  0xa1   : > { %v342_v18 = vsel %vm341_vm1, %v333_v16, 0.0  ;;  %v348_v22 = vsel %vm341_vm1, %v335_v17, 0.0 }
  0xa2   : > { %v312_v20 = vpop.permute.xlu1 %311  ;;  %v306_v21 = vpop.permute.xlu0 %305  ;;  %343 = vadd.xlane.f32.xlu0 %v342_v18 }
  0xa3   : > { %vm328_vm4 = vcmp.eq.s32.totalorder %v300_v11, %v312_v20  ;;  %vm326_vm5 = vcmp.eq.s32.totalorder %v300_v11, %v306_v21 }
  0xa4   : > { %v334_v24 = vsel %vm326_vm5, %v284_v19, 0.0  ;;  %v336_v29 = vsel %vm328_vm4, %v286_v23, 0.0 }
  0xa5   : > { %v345_v25 = vsel %vm341_vm1, %v334_v24, 0.0  ;;  %v351_v33 = vsel %vm341_vm1, %v336_v29, 0.0 }
  0xa6   : > { %v318_v27 = vpop.permute.xlu1 %317  ;;  %v315_v28 = vpop.permute.xlu0 %314  ;;  %346 = vadd.xlane.f32.xlu1 %v345_v25  ;;  %349 = vadd.xlane.f32.xlu0 %v348_v22 }
  0xa7   : > { %vm330_vm6 = vcmp.eq.s32.totalorder %v300_v11, %v318_v27  ;;  %vm329_vm7 = vcmp.eq.s32.totalorder %v300_v11, %v315_v28 }
  0xa8   : > { %v337_v31 = vsel %vm329_vm7, %v287_v26, 0.0  ;;  %v338_v37 = vsel %vm330_vm6, %v288_v30, 0.0 }
  0xa9   : > { %v354_v32 = vsel %vm341_vm1, %v337_v31, 0.0  ;;  %v357_v41 = vsel %vm341_vm1, %v338_v37, 0.0 }
  0xaa   : > { %v324_v35 = vpop.permute.xlu1 %323  ;;  %v321_v36 = vpop.permute.xlu0 %320  ;;  %355 = vadd.xlane.f32.xlu1 %v354_v32  ;;  %352 = vadd.xlane.f32.xlu0 %v351_v33 }
  0xab   : > { %vm332_vm8 = vcmp.eq.s32.totalorder %v300_v11, %v324_v35  ;;  %vm331_vm9 = vcmp.eq.s32.totalorder %v300_v11, %v321_v36 }
  0xac   : > { %v339_v39 = vsel %vm331_vm9, %v289_v34, 0.0  ;;  %v340_v42 = vsel %vm332_vm8, %v290_v38, 0.0 }
  0xad   : > { %v360_v40 = vsel %vm341_vm1, %v339_v39, 0.0  ;;  %v363_v43 = vsel %vm341_vm1, %v340_v42, 0.0 }
  0xae   : > { %361 = vadd.xlane.f32.xlu1 %v360_v40  ;;  %358 = vadd.xlane.f32.xlu0 %v357_v41 }
  0xb2   : > { %364 = vadd.xlane.f32.xlu0 %v363_v43 }
 0x12b   : > { %v344_v44 = vpop.xlane.xlu0 %343 }
 0x12c   : > { %v366_v45 = vadd.f32 1e-08, %v344_v44 }
 0x12e   : > { %707 = vlog2.f32 %v366_v45 }
 0x12f   : > { %v347_v46 = vpop.xlane.xlu1 %346  ;;  %v350_v47 = vpop.xlane.xlu0 %349 }
 0x130   : > { %v367_v48 = vadd.f32 1e-08, %v347_v46  ;;  %v368_v49 = vadd.f32 1e-08, %v350_v47 }
 0x132   : > { %709 = vlog2.f32 %v367_v48 }
 0x133   : > { %711 = vlog2.f32 %v368_v49  ;;  %v356_v50 = vpop.xlane.xlu1 %355  ;;  %v353_v51 = vpop.xlane.xlu0 %352 }
 0x134   : > { %v370_v52 = vadd.f32 1e-08, %v356_v50  ;;  %v369_v53 = vadd.f32 1e-08, %v353_v51 }
 0x136   : > { %713 = vlog2.f32 %v370_v52 }
 0x137   : > { %715 = vlog2.f32 %v369_v53  ;;  %v362_v54 = vpop.xlane.xlu1 %361  ;;  %v359_v55 = vpop.xlane.xlu0 %358 }
 0x138   : > { %v372_v56 = vadd.f32 1e-08, %v362_v54  ;;  %v371_v57 = vadd.f32 1e-08, %v359_v55 }
 0x13a   : > { %717 = vlog2.f32 %v372_v56 }
 0x13b   : > { %v708_v58 = vpop.eup %707  ;;  %719 = vlog2.f32 %v371_v57  ;;  %v365_v59 = vpop.xlane.xlu0 %364 }
 0x13c   : > { %v947_v60 = vmul.f32 0.6931472, %v708_v58  ;;  %v373_v61 = vadd.f32 1e-08, %v365_v59 }
 0x13e   : > { %v390_v62 = vsub.f32 0.0, %v947_v60  ;;  %721 = vlog2.f32 %v373_v61 }
 0x13f   : > { %v710_v63 = vpop.eup %709 }
 0x140   : > { %v712_v0 = vpop.eup %711  ;;  %v950_v1 = vmul.f32 0.6931472, %v710_v63 }
 0x141   : > { %v952_v2 = vmul.f32 0.6931472, %v712_v0 }
 0x142   : > { %v391_v3 = vsub.f32 0.0, %v950_v1 }
 0x143   : > { %v714_v4 = vpop.eup %713  ;;  %v392_v5 = vsub.f32 0.0, %v952_v2 }
 0x144   : > { %v716_v6 = vpop.eup %715  ;;  %v956_v7 = vmul.f32 0.6931472, %v714_v4 }
 0x145   : > { %v958_v8 = vmul.f32 0.6931472, %v716_v6 }
 0x146   : > { %v394_v9 = vsub.f32 0.0, %v956_v7 }
 0x147   : > { %v718_v11 = vpop.eup %717  ;;  %v393_v12 = vsub.f32 0.0, %v958_v8 }
 0x148   : > { %v720_v13 = vpop.eup %719  ;;  %v962_v14 = vmul.f32 0.6931472, %v718_v11 }
 0x149   : > { %v964_v15 = vmul.f32 0.6931472, %v720_v13 }
 0x14a   : > { %v396_v16 = vsub.f32 0.0, %v962_v14  ;;  %402 = sbr.rel (%p619_p1) target bundleno = 555 (0x22b), region = 36 }
 0x14b   : > { %v722_v17 = vpop.eup %721  ;;  %v395_v18 = vsub.f32 0.0, %v964_v15 }
 0x14c   : > { %v968_v19 = vmul.f32 0.6931472, %v722_v17 }
 0x14e   : > { %v397_v20 = vsub.f32 0.0, %v968_v19 }
 0x14f   : > { %vm404_vm10 = vcmask 7168   ;;  %v403_v43 = vld [vmem:[#allocation2] sm:$0x1]  ;;  %vm431_vm11 = vcmask 0  }
 0x150   : > { %v405_v21 = vsel %vm404_vm10, %v390_v62, 0.0  ;;  %v406_v22 = vsel %vm404_vm10, %v391_v3, 0.0  ;;  %v408_v23 = vsel %vm404_vm10, %v392_v5, 0.0  ;;  %v410_v25 = vsel %vm404_vm10, %v393_v12, 0.0 }
 0x151   : > { %v407_v24 = vadd.f32 %v406_v22, %v405_v21  ;;  %v412_v27 = vsel %vm404_vm10, %v394_v9, 0.0  ;;  %v414_v29 = vsel %vm404_vm10, %v395_v18, 0.0  ;;  %v416_v31 = vsel %vm404_vm10, %v396_v16, 0.0 }
 0x152   : > { %v418_v33 = vsel %vm404_vm10, %v397_v20, 0.0 }
 0x153   : > { %v409_v26 = vadd.f32 %v408_v23, %v407_v24 }
 0x155   : > { %v411_v28 = vadd.f32 %v410_v25, %v409_v26 }
 0x157   : > { %v413_v30 = vadd.f32 %v412_v27, %v411_v28 }
 0x159   : > { %v415_v32 = vadd.f32 %v414_v29, %v413_v30 }
 0x15b   : > { %v417_v34 = vadd.f32 %v416_v31, %v415_v32 }
 0x15d   : > { %v419_v35 = vadd.f32 %v418_v33, %v417_v34 }
 0x15f   : > { %420 = vadd.xlane.f32.xlu0 %v419_v35 }
 0x1e8   : > { %v421_v36 = vpop.xlane.xlu0 %420 }
 0x1e9   : > { %v422_v37 = vrot.slane %v421_v36, 4 }
 0x1eb   : > { %v423_v38 = vadd.f32 %v422_v37, %v421_v36 }
 0x1ed   : > { %v424_v39 = vrot.slane %v423_v38, 2 }
 0x1ef   : > { %v425_v40 = vadd.f32 %v424_v39, %v423_v38 }
 0x1f1   : > { %v426_v41 = vrot.slane %v425_v40, 1 }
 0x1f3   : > { %v427_v42 = vadd.f32 %v426_v41, %v425_v40 }
 0x1f5   : > { %626 = vpush %v427_v42 }
 0x226   : > { %s627_s3 = spop %626 }
 0x227   : > { %v429_v44 = vstv %s627_s3 }
 0x228   : > { %v430_v45 = vadd.f32 %v429_v44, %v403_v43 }
 0x22a   : > { %432 = vst.msk [vmem:[#allocation2] sm:$0x1] %vm431_vm11, %v430_v45 }
 0x22b PF: > { %p620_p2 = scmp.le.s32.totalorder %s945_s27, 300 }
 0x22d   : > { %436 = sbr.rel (%p620_p2) target bundleno = 789 (0x315), region = 40 }
 0x232   : > { %v438_v46 = vshrl.u32 %v299_v10, 7  ;;  %v446_v47 = vstv %s617_s30  ;;  %vm472_vm13 = vcmask 7168   ;;  %v471_v31 = vld [vmem:[#allocation2] sm:$0x1]  ;;  %vm499_vm5 = vcmask 0  }
 0x234   : > { %v439_v48 = vadd.s32 8, %v438_v46  ;;  %v440_v49 = vadd.s32 16, %v438_v46  ;;  %v441_v50 = vadd.s32 24, %v438_v46  ;;  %v442_v51 = vadd.s32 32, %v438_v46 }
 0x235   : > { %v443_v52 = vadd.s32 40, %v438_v46  ;;  %v444_v53 = vadd.s32 48, %v438_v46  ;;  %v447_v54 = vadd.s32 %v446_v47, %v438_v46  ;;  %v445_v59 = vadd.s32 56, %v438_v46 }
 0x236   : > { %v448_v55 = vadd.s32 %v446_v47, %v439_v48  ;;  %v449_v56 = vadd.s32 %v446_v47, %v440_v49  ;;  %v450_v57 = vadd.s32 %v446_v47, %v441_v50  ;;  %v451_v58 = vadd.s32 %v446_v47, %v442_v51 }
 0x237   : > { %vm455_vm12 = vcmp.lt.s32.totalorder %v447_v54, 300  ;;  %v452_v61 = vadd.s32 %v446_v47, %v443_v52  ;;  %v453_v63 = vadd.s32 %v446_v47, %v444_v53  ;;  %v454_v13 = vadd.s32 %v446_v47, %v445_v59 }
 0x238   : > { %vm456_vm14 = vcmp.lt.s32.totalorder %v448_v55, 300  ;;  %vm457_vm15 = vcmp.lt.s32.totalorder %v449_v56, 300  ;;  %vm458_vm0 = vcmp.lt.s32.totalorder %v450_v57, 300  ;;  %v463_v10 = vsel %vm455_vm12, %v390_v62, 0.0 }
 0x239   : > { %vm459_vm1 = vcmp.lt.s32.totalorder %v451_v58, 300  ;;  %v464_v0 = vsel %vm456_vm14, %v391_v3, 0.0  ;;  %v465_v4 = vsel %vm457_vm15, %v392_v5, 0.0  ;;  %v466_v6 = vsel %vm458_vm0, %v393_v12, 0.0 }
 0x23a   : > { %v473_v11 = vsel %vm472_vm13, %v463_v10, 0.0  ;;  %vm460_vm2 = vcmp.lt.s32.totalorder %v452_v61, 300  ;;  %v474_v17 = vsel %vm472_vm13, %v464_v0, 0.0  ;;  %v476_v60 = vsel %vm472_vm13, %v465_v4, 0.0 }
 0x23b   : > { %v467_v62 = vsel %vm459_vm1, %v394_v9, 0.0  ;;  %v475_v21 = vadd.f32 %v474_v17, %v473_v11  ;;  %vm461_vm3 = vcmp.lt.s32.totalorder %v453_v63, 300  ;;  %v478_v1 = vsel %vm472_vm13, %v466_v6, 0.0 }
 0x23c   : > { %v468_v2 = vsel %vm460_vm2, %v395_v18, 0.0  ;;  %vm462_vm4 = vcmp.lt.s32.totalorder %v454_v13, 300  ;;  %v480_v5 = vsel %vm472_vm13, %v467_v62, 0.0  ;;  %v469_v8 = vsel %vm461_vm3, %v396_v16, 0.0 }
 0x23d   : > { %v477_v3 = vadd.f32 %v476_v60, %v475_v21  ;;  %v482_v22 = vsel %vm472_vm13, %v468_v2, 0.0  ;;  %v470_v7 = vsel %vm462_vm4, %v397_v20, 0.0  ;;  %v484_v23 = vsel %vm472_vm13, %v469_v8, 0.0 }
 0x23e   : > { %v486_v15 = vsel %vm472_vm13, %v470_v7, 0.0 }
 0x23f   : > { %v479_v12 = vadd.f32 %v478_v1, %v477_v3 }
 0x241   : > { %v481_v9 = vadd.f32 %v480_v5, %v479_v12 }
 0x243   : > { %v483_v24 = vadd.f32 %v482_v22, %v481_v9 }
 0x245   : > { %v485_v18 = vadd.f32 %v484_v23, %v483_v24 }
 0x247   : > { %v487_v25 = vadd.f32 %v486_v15, %v485_v18 }
 0x249   : > { %488 = vadd.xlane.f32.xlu0 %v487_v25 }
 0x2d2   : > { %v489_v26 = vpop.xlane.xlu0 %488 }
 0x2d3   : > { %v490_v27 = vrot.slane %v489_v26, 4 }
 0x2d5   : > { %v491_v28 = vadd.f32 %v490_v27, %v489_v26 }
 0x2d7   : > { %v492_v14 = vrot.slane %v491_v28, 2 }
 0x2d9   : > { %v493_v16 = vadd.f32 %v492_v14, %v491_v28 }
 0x2db   : > { %v494_v29 = vrot.slane %v493_v16, 1 }
 0x2dd   : > { %v495_v30 = vadd.f32 %v494_v29, %v493_v16 }
 0x2df   : > { %628 = vpush %v495_v30 }
 0x310   : > { %s629_s29 = spop %628 }
 0x311   : > { %v497_v19 = vstv %s629_s29 }
 0x312   : > { %v498_v20 = vadd.f32 %v497_v19, %v471_v31 }
 0x314   : > { %500 = vst.msk [vmem:[#allocation2] sm:$0x1] %vm499_vm5, %v498_v20 }
 0x315 PF: > { %p621_p4 = scmp.ne.s32.totalorder %s799_s12, 2 }
 0x317   : > { %504 = sbr.rel (%p621_p4) target bundleno = 849 (0x351), region = 44 }
 0x31c   : > { %v505_v32 = vld [vmem:[#allocation2] sm:$0x1] }
 0x31d   : > { %630 = vpush %v505_v32 }
 0x34e   : > { %s631_s30 = spop %630 }
 0x34f   : > { %v508_v33 = vstv %s631_s30 }
 0x350   : > { %510 = vst [vmem:[%s229_s24] sm:$0xff] %v508_v33 }
 0x351 PF: > { %s623_s4 = sshll.u32 %s803_s13, 7  ;;  %s525_s12 = sshll.u32 %s229_s24, 4  ;;  %s526_s12 = int_to_ptr.vmem [resolvable:$true] %s525_s12 }
 0x352   : > { %s523_s7 = scalar_lea.hbm %s1069_s2, %s623_s4  ;;  %s512_s8 = scalar_lea.sflag [#allocation4], %s227_s26 }
 0x353   : > { %s723_s17 = scalar_lea.vmem %s526_s12, 128  ;;  %s819_s18 = smov [#allocation3]  }
 0x354   : > { %p724_p5 = scmp.ne.s32.totalorder %s526_s12, %s723_s17  ;;  %s727_s23 = sshll.u32 %s819_s18, 4  ;;  %s728_s23 = int_to_ptr.vmem [resolvable:$false] %s727_s23 }
 0x355   : > { %s729_s27 = scalar_lea.vmem %s728_s23, 256  ;;  %p730_p8 = scmp.lt.s32.totalorder %s526_s12, %s728_s23 }
 0x356   : > { %p725_p6 = pnand %p724_p5, %p884_p3  ;;  %p731_p10 = scmp.lt.s32.totalorder %s729_s27, %s723_s17 }
 0x358   : > { %p726_p7 = pneg %p725_p6  ;;  %p732_p11 = por %p731_p10, %p730_p8 }
 0x35a   : > { %p733_p12 = pnand %p732_p11, %p726_p7 }
 0x35c   : > { %736 = shalt.err (!%p733_p12)
}
 0x35d   : > { %s737_s13 = scalar_lea.hbm %s523_s7, 128  ;;  %s741_s24 = scalar_lea.hbm %s1069_s2, 256 }
 0x35e   : > { %p738_p13 = scmp.ne.s32.totalorder %s523_s7, %s737_s13  ;;  %p742_p2 = scmp.lt.s32.totalorder %s523_s7, %s1069_s2 }
 0x35f   : > { %p743_p4 = scmp.lt.s32.totalorder %s741_s24, %s737_s13 }
 0x360   : > { %p739_p0 = pnand %p738_p13, %p884_p3 }
 0x361   : > { %p744_p5 = por %p743_p4, %p742_p2 }
 0x362   : > { %p740_p1 = pneg %p739_p0 }
 0x364   : > { %p745_p6 = pnand %p744_p5, %p740_p1 }
 0x366   : > { %748 = shalt.err (!%p745_p6)
}
 0x367   : > { %632 = dma.vmem_to_hbm [thread:$0]  (%p884_p3), %s526_s12, 128, %s523_s7, %s512_s8  }
 0x368 PF: > { %p638_p7 = scmp.ge.s32.totalorder %s815_s16, 2  ;;  %s537_s30 = sand.u32 1, %s787_s9  }
 0x369   : > { %s538_s4 = scalar_lea.sflag [#allocation4], %s537_s30 }
 0x36a   : > { %p635_p8 = pnand %p638_p7, %p894_p9 }
 0x36c   : > { %p636_p10 = pneg %p635_p8 }
 0x36e   : > { %782 = dma.done.wait (%p636_p10), %s538_s4, 128  }
 0x36f   : > { %784 = vsyncadd (%p636_p10), %s538_s4, 4294967168  ;;  %s15_s16 = sadd.s32 1, %s815_s16   ;;  %s1072_s9 = smov %s791_s10 }
 0x370   : > { %p12_p11 = scmp.ge.s32.totalorder %s15_s16, 8   ;;  %s1073_s10 = smov %s795_s11 }
 0x371   : > { %s1074_s11 = smov %s902_s25  ;;  %s1075_s12 = smov %s807_s14 }
 0x372   : > { %s1076_s13 = smov %s811_s15  ;;  %s1077_s14 = smov %s1080_s19 }
 0x373   : > { %s1078_s15 = smov %s1084_s20  ;;  %14 = sbr.rel (!%p12_p11) target bundleno = 5 (0x5), region = 82 }
 0x378   :  { %543 = vsyncpa [#allocation4], 1 }
 0x379   :  { %545 = vsyncpa [#allocation4 + $0x1], 1 }

</bundles_post_ra>
